<compile_context>
chip_gen: v7x
topology: tpu7x:2x2x1
jax: 0.10.0
libtpu: 0.0.40
codegen_flags: <defaults>
</compile_context>

<pallas_src>
import numpy as np
import jax
import jax.numpy as jnp
from jax.experimental import pallas as pl
from jax.experimental.pallas import tpu as pltpu


# ----------------------------------------------------------------------------------
# Pallas kernel
# ----------------------------------------------------------------------------------
def _make_decoder_kernel(apply_out_act: bool, C: int, cout: int, F: int, vstride: int):
    """apply_out_act = (not is_last): apply the trailing BN + ELU."""
    cout2 = 2 * cout

    def kernel(x_ref, xen_ref, res_cache_ref, conv_cache_ref,
               skip_w_ref, res_w_ref, dec_w_ref, vec_ref,
               y_out_ref, new_res_cache_ref, new_conv_cache_ref,
               win_ref):
        L = x_ref.shape[1]                 # lanes = B*F (batch folded into lane axis)
        wdt = win_ref.dtype                # matmul operand dtype (bf16 by default)

        # Hoisted once: per-lane in-frame frequency index and the two freq-tap
        # boundary masks, shared by all uses in both streaming convs.
        col_f = jax.lax.broadcasted_iota(jnp.int32, (C, L), 1) % F
        mask_l = col_f >= 1                # valid lanes for the f-1 tap
        mask_r = col_f <= F - 2            # valid lanes for the f+1 tap

        def shift_m1(a):   # a[:, f-1], zero at f == 0 (per batch slot)
            return jnp.where(mask_l, pltpu.roll(a, shift=1, axis=1), 0.0)

        def shift_p1(a):   # a[:, f+1], zero at f == F-1 (per batch slot)
            return jnp.where(mask_r, pltpu.roll(a, shift=L - 1, axis=1), 0.0)

        def elu(v):
            return jnp.where(v > 0.0, v, jnp.exp(jnp.minimum(v, 0.0)) - 1.0)

        def stream_conv(frames, w_ref):
            # Streaming Conv2d(kernel=(4,3), padding=(0,1)) as ONE MXU matmul:
            # the 12 (time, freq-tap) shifted frames are written lane-dense into the
            # bf16 im2col scratch with row order (kt, kf, ci) and contracted against
            # the pre-reshaped (Cout, 12*C) weights.  Conv biases are folded into the
            # BN shifts in the wrapper, so there is no bias add here.
            for kt in range(4):
                fr = frames[kt]
                taps = (shift_m1(fr), fr, shift_p1(fr))
                for kf in range(3):
                    r0 = (kt * 3 + kf) * C
                    win_ref[r0:r0 + C, :] = taps[kf].astype(wdt)
            return jnp.dot(w_ref[...], win_ref[...],
                           preferred_element_type=jnp.float32)

        # Per-channel vectors arrive packed in one (5*vstride, 1) block (single DMA).
        vec = vec_ref[...]
        skip_b = vec[0 * vstride:0 * vstride + C, :]
        res_scale = vec[1 * vstride:1 * vstride + C, :]
        res_shift = vec[2 * vstride:2 * vstride + C, :]
        out_scale = vec[3 * vstride:3 * vstride + cout2, :]
        out_shift = vec[4 * vstride:4 * vstride + cout2, :]

        # skip connection: y = x + Conv2d(C, C, 1)(x_en)
        y = (x_ref[...]
             + jnp.dot(skip_w_ref[...], xen_ref[...],
                       preferred_element_type=jnp.float32)
             + skip_b)

        # ---- ResidualBlock: StreamConv2d(C, C, (4,3)) -> BN -> ELU -> + y ----
        z = stream_conv([res_cache_ref[0], res_cache_ref[1], res_cache_ref[2], y],
                        res_w_ref)
        y2 = elu(z * res_scale + res_shift) + y

        # ---- streaming cache updates (keep last 3 time frames) ----
        new_res_cache_ref[0:2] = res_cache_ref[1:3]
        new_res_cache_ref[2] = y
        new_conv_cache_ref[0:2] = conv_cache_ref[1:3]
        new_conv_cache_ref[2] = y2

        # ---- SubpixelConv2d: StreamConv2d(C, 2*Cout, (4,3)) + rearrange ----
        w = stream_conv([conv_cache_ref[0], conv_cache_ref[1], conv_cache_ref[2], y2],
                        dec_w_ref)                         # (2*Cout, L)
        w = w * out_scale + out_shift                      # folded BN (or bias if last)
        if apply_out_act:                                  # ELU only when not is_last
            w = elu(w)

        # rearrange 'b (r c) t f -> b c t (r f)': two lane-dense half stores,
        # output lane order (r, b, f); re-ordered to (b, r, f) in the wrapper.
        y_out_ref[:, 0:L] = w[0:cout, :]
        y_out_ref[:, L:2 * L] = w[cout:cout2, :]

    return kernel


# ----------------------------------------------------------------------------------
# JAX wrapper
# ----------------------------------------------------------------------------------
def decoder_block_forward(x, x_en, conv_cache, res_cache, params, *,
                          is_last=False, eps=1e-5, compute_dtype=jnp.bfloat16):
    """
    x, x_en:     (B, C, 1, F)
    conv_cache:  (B, C, 3, F)
    res_cache:   (B, C, 3, F)
    returns: y (B, Cout, 1, 2F), conv_cache_out (B, C, 3, F), res_cache_out (B, C, 3, F)
    """
    B, C, _, F = x.shape
    cout2 = params["dec_w"].shape[0]
    cout = cout2 // 2
    L = B * F                                 # lane width after batch folding

    # ---- tiny parameter prep: fold BN (+ conv biases), im2col-order the weights ----
    def fold_bn(gamma, beta, mean, var):
        scale = gamma / jnp.sqrt(var + eps)
        return scale, beta - mean * scale

    def prep_w(w):   # (Co, C, 4, 3) -> (Co, 4*3*C), rows ordered (kt, kf, ci)
        return (jnp.transpose(w, (0, 2, 3, 1))
                .reshape(w.shape[0], 12 * C).astype(compute_dtype))

    skip_w = params["skip_w"].reshape(C, C).astype(compute_dtype)
    res_w = prep_w(params["res_w"])
    dec_w = prep_w(params["dec_w"])

    res_scale, res_shift = fold_bn(params["res_gamma"], params["res_beta"],
                                   params["res_mean"], params["res_var"])
    res_shift = params["res_b"] * res_scale + res_shift       # fold conv bias into BN

    if is_last:
        out_scale = jnp.ones((cout2,), jnp.float32)
        out_shift = params["dec_b"].astype(jnp.float32)
    else:
        osc, osh = fold_bn(params["out_gamma"], params["out_beta"],
                           params["out_mean"], params["out_var"])
        out_scale = jnp.tile(osc, 2)                 # channel index = r*Cout + c
        out_shift = params["dec_b"] * out_scale + jnp.tile(osh, 2)

    # pack the five per-channel vectors into ONE (5*vstride, 1) block -> single DMA
    vstride = ((max(C, cout2) + 7) // 8) * 8
    def pad_to(v):
        return jnp.pad(v.astype(jnp.float32), (0, vstride - v.shape[0]))
    vec = jnp.concatenate([pad_to(params["skip_b"]), pad_to(res_scale),
                           pad_to(res_shift), pad_to(out_scale),
                           pad_to(out_shift)]).reshape(5 * vstride, 1)

    # ---- lane packing: fold batch into the lane axis (lane = b*F + f) ----
    x2 = jnp.transpose(x[:, :, 0, :], (1, 0, 2)).reshape(C, L)
    xen2 = (jnp.transpose(x_en[:, :, 0, :], (1, 0, 2))
            .reshape(C, L).astype(compute_dtype))
    res_c = jnp.transpose(res_cache, (2, 1, 0, 3)).reshape(3, C, L)
    conv_c = jnp.transpose(conv_cache, (2, 1, 0, 3)).reshape(3, C, L)

    kernel = _make_decoder_kernel(apply_out_act=not is_last, C=C, cout=cout,
                                  F=F, vstride=vstride)

    y_pk, new_res_c, new_conv_c = pl.pallas_call(
        kernel,
        grid=(1,),
        in_specs=[
            pl.BlockSpec((C, L), lambda i: (0, 0)),              # x   (packed lanes)
            pl.BlockSpec((C, L), lambda i: (0, 0)),              # x_en (bf16)
            pl.BlockSpec((3, C, L), lambda i: (0, 0, 0)),        # res_cache
            pl.BlockSpec((3, C, L), lambda i: (0, 0, 0)),        # conv_cache
            pl.BlockSpec((C, C), lambda i: (0, 0)),              # skip_w (bf16)
            pl.BlockSpec((C, 12 * C), lambda i: (0, 0)),         # res_w (im2col, bf16)
            pl.BlockSpec((cout2, 12 * C), lambda i: (0, 0)),     # dec_w (im2col, bf16)
            pl.BlockSpec((5 * vstride, 1), lambda i: (0, 0)),    # packed per-ch vectors
        ],
        out_specs=[
            pl.BlockSpec((cout, 2 * L), lambda i: (0, 0)),       # y  (lane order r,b,f)
            pl.BlockSpec((3, C, L), lambda i: (0, 0, 0)),        # new res_cache
            pl.BlockSpec((3, C, L), lambda i: (0, 0, 0)),        # new conv_cache
        ],
        out_shape=(
            jax.ShapeDtypeStruct((cout, 2 * L), jnp.float32),
            jax.ShapeDtypeStruct((3, C, L), jnp.float32),
            jax.ShapeDtypeStruct((3, C, L), jnp.float32),
        ),
        scratch_shapes=[pltpu.VMEM((12 * C, L), compute_dtype)], # im2col window
        compiler_params=pltpu.CompilerParams(
            dimension_semantics=("arbitrary",)),
    )(x2, xen2, res_c, conv_c, skip_w, res_w, dec_w, vec)

    # ---- un-pack back to the module's layouts ----
    # y_pk lanes are (r, b, f); target is (B, Cout, 1, (r f)).
    y = (jnp.transpose(y_pk.reshape(cout, 2, B, F), (2, 0, 1, 3))
         .reshape(B, cout, 1, 2 * F))
    res_cache_out = jnp.transpose(new_res_c.reshape(3, C, B, F), (2, 1, 0, 3))
    conv_cache_out = jnp.transpose(new_conv_c.reshape(3, C, B, F), (2, 1, 0, 3))
    return y, conv_cache_out, res_cache_out


# ----------------------------------------------------------------------------------
# Plain-JAX reference (mirrors the PyTorch module, inference-mode BN)
# ----------------------------------------------------------------------------------
def decoder_block_reference(x, x_en, conv_cache, res_cache, params, *,
                            is_last=False, eps=1e-5):
    P = jax.lax.Precision.HIGHEST

    def elu(v):
        return jnp.where(v > 0.0, v, jnp.exp(jnp.minimum(v, 0.0)) - 1.0)

    def bn(v, gamma, beta, mean, var):
        scale = gamma / jnp.sqrt(var + eps)
        shift = beta - mean * scale
        return v * scale[None, :, None, None] + shift[None, :, None, None]

    def stream_conv(w, b, v, cache):
        inp = jnp.concatenate([cache, v], axis=2)                 # (B, C, 4, F)
        new_cache = inp[:, :, 1:, :]
        inp_p = jnp.pad(inp, ((0, 0), (0, 0), (0, 0), (1, 1)))    # freq padding = 1
        F = v.shape[-1]
        acc = 0.0
        for kh in range(4):
            for kw in range(3):
                acc = acc + jnp.einsum('oi,bif->bof', w[:, :, kh, kw],
                                       inp_p[:, :, kh, kw:kw + F], precision=P)
        return acc[:, :, None, :] + b[None, :, None, None], new_cache

    skip_w = params["skip_w"].reshape(params["skip_w"].shape[0], -1)
    y = (x + jnp.einsum('oi,bitf->botf', skip_w, x_en, precision=P)
         + params["skip_b"][None, :, None, None])

    z, res_cache_out = stream_conv(params["res_w"], params["res_b"], y, res_cache)
    z = elu(bn(z, params["res_gamma"], params["res_beta"],
               params["res_mean"], params["res_var"]))
    y2 = z + y

    w, conv_cache_out = stream_conv(params["dec_w"], params["dec_b"], y2, conv_cache)
    B, C2, T, F = w.shape
    cout = C2 // 2
    w = w.reshape(B, 2, cout, T, F)
    w = jnp.transpose(w, (0, 2, 3, 1, 4)).reshape(B, cout, T, 2 * F)   # (r f) flatten
    if not is_last:
        w = elu(bn(w, params["out_gamma"], params["out_beta"],
                   params["out_mean"], params["out_var"]))
    return w, conv_cache_out, res_cache_out


# ----------------------------------------------------------------------------------
if __name__ == "__main__":
    B, C_IN, C_OUT, F = 2, 16, 8, 64           # B*F = 128 lanes after packing
    key = jax.random.PRNGKey(0)
    ks = jax.random.split(key, 18)

    params = {
        "skip_w": 0.3 * jax.random.normal(ks[0], (C_IN, C_IN, 1, 1), jnp.float32),
        "skip_b": 0.1 * jax.random.normal(ks[1], (C_IN,), jnp.float32),
        "res_w": 0.2 * jax.random.normal(ks[2], (C_IN, C_IN, 4, 3), jnp.float32),
        "res_b": 0.1 * jax.random.normal(ks[3], (C_IN,), jnp.float32),
        "res_gamma": 1.0 + 0.1 * jax.random.normal(ks[4], (C_IN,), jnp.float32),
        "res_beta": 0.1 * jax.random.normal(ks[5], (C_IN,), jnp.float32),
        "res_mean": 0.1 * jax.random.normal(ks[6], (C_IN,), jnp.float32),
        "res_var": jax.random.uniform(ks[7], (C_IN,), jnp.float32, 0.5, 1.5),
        "dec_w": 0.2 * jax.random.normal(ks[8], (2 * C_OUT, C_IN, 4, 3), jnp.float32),
        "dec_b": 0.1 * jax.random.normal(ks[9], (2 * C_OUT,), jnp.float32),
        "out_gamma": 1.0 + 0.1 * jax.random.normal(ks[10], (C_OUT,), jnp.float32),
        "out_beta": 0.1 * jax.random.normal(ks[11], (C_OUT,), jnp.float32),
        "out_mean": 0.1 * jax.random.normal(ks[12], (C_OUT,), jnp.float32),
        "out_var": jax.random.uniform(ks[13], (C_OUT,), jnp.float32, 0.5, 1.5),
    }
    x = jax.random.normal(ks[14], (B, C_IN, 1, F), jnp.float32)
    x_en = jax.random.normal(ks[15], (B, C_IN, 1, F), jnp.float32)
    conv_cache = jax.random.normal(ks[16], (B, C_IN, 3, F), jnp.float32)
    res_cache = jax.random.normal(ks[17], (B, C_IN, 3, F), jnp.float32)

    y_ref, cc_ref, rc_ref = decoder_block_reference(x, x_en, conv_cache, res_cache,
                                                    params, is_last=False)

    # ---- f32-operand path: tight accuracy check of the kernel structure ----
    fwd_f32 = jax.jit(lambda *a: decoder_block_forward(
        *a, is_last=False, compute_dtype=jnp.float32))
    y32, cc32, rc32 = fwd_f32(x, x_en, conv_cache, res_cache, params)
    jax.block_until_ready((y32, cc32, rc32))
    np.testing.assert_allclose(np.asarray(y32), np.asarray(y_ref), rtol=3e-3, atol=3e-3)
    np.testing.assert_allclose(np.asarray(cc32), np.asarray(cc_ref), rtol=3e-3, atol=3e-3)
    np.testing.assert_allclose(np.asarray(rc32), np.asarray(rc_ref), rtol=3e-3, atol=3e-3)

    # ---- default (bf16-operand) path: production configuration ----
    fwd = jax.jit(lambda *a: decoder_block_forward(*a, is_last=False))
    y, conv_cache_out, res_cache_out = fwd(x, x_en, conv_cache, res_cache, params)
    jax.block_until_ready((y, conv_cache_out, res_cache_out))
    np.testing.assert_allclose(np.asarray(y), np.asarray(y_ref), rtol=0.1, atol=0.1)
    np.testing.assert_allclose(np.asarray(conv_cache_out), np.asarray(cc_ref),
                               rtol=0.1, atol=0.1)
    np.testing.assert_allclose(np.asarray(res_cache_out), np.asarray(rc_ref),
                               rtol=0.1, atol=0.1)

    assert y.shape == (B, C_OUT, 1, 2 * F)
    assert conv_cache_out.shape == (B, C_IN, 3, F)
    assert res_cache_out.shape == (B, C_IN, 3, F)

    print("KERNEL_OK")
</pallas_src>

<mosaic_0001>
module attributes {stable_mosaic.version = 11 : i64} {
  func.func @kernel(%arg0: i32, %arg1: memref<16x128xf32, #tpu.memory_space<vmem>>, %arg2: memref<16x128xf32, #tpu.memory_space<vmem>>, %arg3: memref<3x16x128xf32, #tpu.memory_space<vmem>>, %arg4: memref<3x16x128xf32, #tpu.memory_space<vmem>>, %arg5: memref<16x16xf32, #tpu.memory_space<vmem>>, %arg6: memref<16x192xf32, #tpu.memory_space<vmem>>, %arg7: memref<16x192xf32, #tpu.memory_space<vmem>>, %arg8: memref<80x1xf32, #tpu.memory_space<vmem>>, %arg9: memref<8x256xf32, #tpu.memory_space<vmem>>, %arg10: memref<3x16x128xf32, #tpu.memory_space<vmem>>, %arg11: memref<3x16x128xf32, #tpu.memory_space<vmem>>, %arg12: memref<192x128xf32, #tpu.memory_space<vmem>>) attributes {dimension_semantics = [#tpu.dimension_semantics<arbitrary>], iteration_bounds = array<i64: 1>, scalar_prefetch = 0 : i64, scratch_operands = 1 : i64, tpu.core_type = #tpu.core_type<tc>, window_params = [{pipeline_mode = #tpu.pipeline_mode<synchronous>, transform_indices = @transform_0, window_bounds = array<i64: 16, 128>}, {pipeline_mode = #tpu.pipeline_mode<synchronous>, transform_indices = @transform_1, window_bounds = array<i64: 16, 128>}, {pipeline_mode = #tpu.pipeline_mode<synchronous>, transform_indices = @transform_2, window_bounds = array<i64: 3, 16, 128>}, {pipeline_mode = #tpu.pipeline_mode<synchronous>, transform_indices = @transform_3, window_bounds = array<i64: 3, 16, 128>}, {pipeline_mode = #tpu.pipeline_mode<synchronous>, transform_indices = @transform_4, window_bounds = array<i64: 16, 16>}, {pipeline_mode = #tpu.pipeline_mode<synchronous>, transform_indices = @transform_5, window_bounds = array<i64: 16, 192>}, {pipeline_mode = #tpu.pipeline_mode<synchronous>, transform_indices = @transform_6, window_bounds = array<i64: 16, 192>}, {pipeline_mode = #tpu.pipeline_mode<synchronous>, transform_indices = @transform_7, window_bounds = array<i64: 80, 1>}, {pipeline_mode = #tpu.pipeline_mode<synchronous>, transform_indices = @transform_8, window_bounds = array<i64: 8, 256>}, {pipeline_mode = #tpu.pipeline_mode<synchronous>, transform_indices = @transform_9, window_bounds = array<i64: 3, 16, 128>}, {pipeline_mode = #tpu.pipeline_mode<synchronous>, transform_indices = @transform_10, window_bounds = array<i64: 3, 16, 128>}]} {
    %0 = tpu.iota {dimensions = array<i32: 1>} : vector<16x128xi32>
    %c64_i32 = arith.constant 64 : i32
    %c0_i32 = arith.constant 0 : i32
    %1 = arith.cmpi eq, %c64_i32, %c0_i32 : i32
    %c1_i32 = arith.constant 1 : i32
    %2 = arith.select %1, %c1_i32, %c64_i32 : i32
    %3 = vector.broadcast %2 : i32 to vector<16x128xi32>
    %4 = arith.remsi %0, %3 : vector<16x128xi32>
    %c0_i32_0 = arith.constant 0 : i32
    %5 = vector.broadcast %c0_i32_0 : i32 to vector<16x128xi32>
    %6 = arith.cmpi ne, %4, %5 : vector<16x128xi32>
    %c0_i32_1 = arith.constant 0 : i32
    %7 = vector.broadcast %c0_i32_1 : i32 to vector<16x128xi32>
    %8 = arith.cmpi slt, %4, %7 : vector<16x128xi32>
    %c0_i32_2 = arith.constant 0 : i32
    %9 = arith.cmpi slt, %2, %c0_i32_2 : i32
    %10 = vector.broadcast %9 : i1 to vector<16x128xi1>
    %11 = vector.broadcast %10 : vector<16x128xi1> to vector<16x128xi1>
    %12 = arith.xori %8, %11 : vector<16x128xi1>
    %13 = arith.andi %12, %6 : vector<16x128xi1>
    %14 = vector.broadcast %2 : i32 to vector<16x128xi32>
    %15 = arith.addi %4, %14 : vector<16x128xi32>
    %16 = arith.select %13, %15, %4 : vector<16x128xi1>, vector<16x128xi32>
    %c1_i32_3 = arith.constant 1 : i32
    %17 = vector.broadcast %c1_i32_3 : i32 to vector<16x128xi32>
    %18 = arith.cmpi sge, %16, %17 : vector<16x128xi32>
    %c62_i32 = arith.constant 62 : i32
    %19 = vector.broadcast %c62_i32 : i32 to vector<16x128xi32>
    %20 = arith.cmpi sle, %16, %19 : vector<16x128xi32>
    %c0 = arith.constant 0 : index
    %c0_4 = arith.constant 0 : index
    %21 = vector.load %arg8[%c0, %c0_4] : memref<80x1xf32, #tpu.memory_space<vmem>>, vector<80x1xf32>
    %22 = vector.extract_strided_slice %21 {offsets = [0, 0], sizes = [16, 1], strides = [1, 1]} : vector<80x1xf32> to vector<16x1xf32>
    %23 = vector.extract_strided_slice %21 {offsets = [16, 0], sizes = [16, 1], strides = [1, 1]} : vector<80x1xf32> to vector<16x1xf32>
    %24 = vector.extract_strided_slice %21 {offsets = [32, 0], sizes = [16, 1], strides = [1, 1]} : vector<80x1xf32> to vector<16x1xf32>
    %25 = vector.extract_strided_slice %21 {offsets = [48, 0], sizes = [16, 1], strides = [1, 1]} : vector<80x1xf32> to vector<16x1xf32>
    %26 = vector.extract_strided_slice %21 {offsets = [64, 0], sizes = [16, 1], strides = [1, 1]} : vector<80x1xf32> to vector<16x1xf32>
    %c0_5 = arith.constant 0 : index
    %c0_6 = arith.constant 0 : index
    %27 = vector.load %arg1[%c0_5, %c0_6] : memref<16x128xf32, #tpu.memory_space<vmem>>, vector<16x128xf32>
    %c0_7 = arith.constant 0 : index
    %c0_8 = arith.constant 0 : index
    %28 = vector.load %arg5[%c0_7, %c0_8] : memref<16x16xf32, #tpu.memory_space<vmem>>, vector<16x16xf32>
    %c0_9 = arith.constant 0 : index
    %c0_10 = arith.constant 0 : index
    %29 = vector.load %arg2[%c0_9, %c0_10] : memref<16x128xf32, #tpu.memory_space<vmem>>, vector<16x128xf32>
    %cst = arith.constant dense<0.000000e+00> : vector<16x128xf32>
    %30 = tpu.matmul %28, %29, %cst {dimension_numbers = #tpu.dot_dimension_numbers<[1], [0], [0], [1], [0, 0, 1, 1], [], []>} : vector<16x16xf32>, vector<16x128xf32>, vector<16x128xf32> -> vector<16x128xf32>
    %31 = arith.addf %27, %30 : vector<16x128xf32>
    %32 = vector.broadcast %22 : vector<16x1xf32> to vector<16x128xf32>
    %33 = arith.addf %31, %32 : vector<16x128xf32>
    %c0_11 = arith.constant 0 : index
    %c0_12 = arith.constant 0 : index
    %c0_13 = arith.constant 0 : index
    %34 = vector.load %arg3[%c0_11, %c0_12, %c0_13] : memref<3x16x128xf32, #tpu.memory_space<vmem>>, vector<1x16x128xf32>
    %35 = vector.shape_cast %34 : vector<1x16x128xf32> to vector<16x128xf32>
    %c1 = arith.constant 1 : index
    %c0_14 = arith.constant 0 : index
    %c0_15 = arith.constant 0 : index
    %36 = vector.load %arg3[%c1, %c0_14, %c0_15] : memref<3x16x128xf32, #tpu.memory_space<vmem>>, vector<1x16x128xf32>
    %37 = vector.shape_cast %36 : vector<1x16x128xf32> to vector<16x128xf32>
    %c2 = arith.constant 2 : index
    %c0_16 = arith.constant 0 : index
    %c0_17 = arith.constant 0 : index
    %38 = vector.load %arg3[%c2, %c0_16, %c0_17] : memref<3x16x128xf32, #tpu.memory_space<vmem>>, vector<1x16x128xf32>
    %39 = vector.shape_cast %38 : vector<1x16x128xf32> to vector<16x128xf32>
    %c1_i32_18 = arith.constant 1 : i32
    %40 = tpu.dynamic_rotate %35 by %c1_i32_18 dim 1 : vector<16x128xf32>, i32 -> vector<16x128xf32>
    %cst_19 = arith.constant 0.000000e+00 : f32
    %41 = vector.broadcast %cst_19 : f32 to vector<16x128xf32>
    %42 = arith.select %18, %40, %41 : vector<16x128xi1>, vector<16x128xf32>
    %c127_i32 = arith.constant 127 : i32
    %43 = tpu.dynamic_rotate %35 by %c127_i32 dim 1 : vector<16x128xf32>, i32 -> vector<16x128xf32>
    %cst_20 = arith.constant 0.000000e+00 : f32
    %44 = vector.broadcast %cst_20 : f32 to vector<16x128xf32>
    %45 = arith.select %20, %43, %44 : vector<16x128xi1>, vector<16x128xf32>
    %c0_21 = arith.constant 0 : index
    %c0_22 = arith.constant 0 : index
    %46 = vector.load %arg12[%c0_21, %c0_22] : memref<192x128xf32, #tpu.memory_space<vmem>>, vector<16x128xf32>
    tpu.vector_store %arg12[%c0_21, %c0_22], %42 {strides = array<i32>} : memref<192x128xf32, #tpu.memory_space<vmem>>, vector<16x128xf32>,
    %c16 = arith.constant 16 : index
    %c0_23 = arith.constant 0 : index
    %47 = vector.load %arg12[%c16, %c0_23] : memref<192x128xf32, #tpu.memory_space<vmem>>, vector<16x128xf32>
    tpu.vector_store %arg12[%c16, %c0_23], %35 {strides = array<i32>} : memref<192x128xf32, #tpu.memory_space<vmem>>, vector<16x128xf32>,
    %c32 = arith.constant 32 : index
    %c0_24 = arith.constant 0 : index
    %48 = vector.load %arg12[%c32, %c0_24] : memref<192x128xf32, #tpu.memory_space<vmem>>, vector<16x128xf32>
    tpu.vector_store %arg12[%c32, %c0_24], %45 {strides = array<i32>} : memref<192x128xf32, #tpu.memory_space<vmem>>, vector<16x128xf32>,
    %c1_i32_25 = arith.constant 1 : i32
    %49 = tpu.dynamic_rotate %37 by %c1_i32_25 dim 1 : vector<16x128xf32>, i32 -> vector<16x128xf32>
    %cst_26 = arith.constant 0.000000e+00 : f32
    %50 = vector.broadcast %cst_26 : f32 to vector<16x128xf32>
    %51 = arith.select %18, %49, %50 : vector<16x128xi1>, vector<16x128xf32>
    %c127_i32_27 = arith.constant 127 : i32
    %52 = tpu.dynamic_rotate %37 by %c127_i32_27 dim 1 : vector<16x128xf32>, i32 -> vector<16x128xf32>
    %cst_28 = arith.constant 0.000000e+00 : f32
    %53 = vector.broadcast %cst_28 : f32 to vector<16x128xf32>
    %54 = arith.select %20, %52, %53 : vector<16x128xi1>, vector<16x128xf32>
    %c48 = arith.constant 48 : index
    %c0_29 = arith.constant 0 : index
    %55 = vector.load %arg12[%c48, %c0_29] : memref<192x128xf32, #tpu.memory_space<vmem>>, vector<16x128xf32>
    tpu.vector_store %arg12[%c48, %c0_29], %51 {strides = array<i32>} : memref<192x128xf32, #tpu.memory_space<vmem>>, vector<16x128xf32>,
    %c64 = arith.constant 64 : index
    %c0_30 = arith.constant 0 : index
    %56 = vector.load %arg12[%c64, %c0_30] : memref<192x128xf32, #tpu.memory_space<vmem>>, vector<16x128xf32>
    tpu.vector_store %arg12[%c64, %c0_30], %37 {strides = array<i32>} : memref<192x128xf32, #tpu.memory_space<vmem>>, vector<16x128xf32>,
    %c80 = arith.constant 80 : index
    %c0_31 = arith.constant 0 : index
    %57 = vector.load %arg12[%c80, %c0_31] : memref<192x128xf32, #tpu.memory_space<vmem>>, vector<16x128xf32>
    tpu.vector_store %arg12[%c80, %c0_31], %54 {strides = array<i32>} : memref<192x128xf32, #tpu.memory_space<vmem>>, vector<16x128xf32>,
    %c1_i32_32 = arith.constant 1 : i32
    %58 = tpu.dynamic_rotate %39 by %c1_i32_32 dim 1 : vector<16x128xf32>, i32 -> vector<16x128xf32>
    %cst_33 = arith.constant 0.000000e+00 : f32
    %59 = vector.broadcast %cst_33 : f32 to vector<16x128xf32>
    %60 = arith.select %18, %58, %59 : vector<16x128xi1>, vector<16x128xf32>
    %c127_i32_34 = arith.constant 127 : i32
    %61 = tpu.dynamic_rotate %39 by %c127_i32_34 dim 1 : vector<16x128xf32>, i32 -> vector<16x128xf32>
    %cst_35 = arith.constant 0.000000e+00 : f32
    %62 = vector.broadcast %cst_35 : f32 to vector<16x128xf32>
    %63 = arith.select %20, %61, %62 : vector<16x128xi1>, vector<16x128xf32>
    %c96 = arith.constant 96 : index
    %c0_36 = arith.constant 0 : index
    %64 = vector.load %arg12[%c96, %c0_36] : memref<192x128xf32, #tpu.memory_space<vmem>>, vector<16x128xf32>
    tpu.vector_store %arg12[%c96, %c0_36], %60 {strides = array<i32>} : memref<192x128xf32, #tpu.memory_space<vmem>>, vector<16x128xf32>,
    %c112 = arith.constant 112 : index
    %c0_37 = arith.constant 0 : index
    %65 = vector.load %arg12[%c112, %c0_37] : memref<192x128xf32, #tpu.memory_space<vmem>>, vector<16x128xf32>
    tpu.vector_store %arg12[%c112, %c0_37], %39 {strides = array<i32>} : memref<192x128xf32, #tpu.memory_space<vmem>>, vector<16x128xf32>,
    %c128 = arith.constant 128 : index
    %c0_38 = arith.constant 0 : index
    %66 = vector.load %arg12[%c128, %c0_38] : memref<192x128xf32, #tpu.memory_space<vmem>>, vector<16x128xf32>
    tpu.vector_store %arg12[%c128, %c0_38], %63 {strides = array<i32>} : memref<192x128xf32, #tpu.memory_space<vmem>>, vector<16x128xf32>,
    %c1_i32_39 = arith.constant 1 : i32
    %67 = tpu.dynamic_rotate %33 by %c1_i32_39 dim 1 : vector<16x128xf32>, i32 -> vector<16x128xf32>
    %cst_40 = arith.constant 0.000000e+00 : f32
    %68 = vector.broadcast %cst_40 : f32 to vector<16x128xf32>
    %69 = arith.select %18, %67, %68 : vector<16x128xi1>, vector<16x128xf32>
    %c127_i32_41 = arith.constant 127 : i32
    %70 = tpu.dynamic_rotate %33 by %c127_i32_41 dim 1 : vector<16x128xf32>, i32 -> vector<16x128xf32>
    %cst_42 = arith.constant 0.000000e+00 : f32
    %71 = vector.broadcast %cst_42 : f32 to vector<16x128xf32>
    %72 = arith.select %20, %70, %71 : vector<16x128xi1>, vector<16x128xf32>
    %c144 = arith.constant 144 : index
    %c0_43 = arith.constant 0 : index
    %73 = vector.load %arg12[%c144, %c0_43] : memref<192x128xf32, #tpu.memory_space<vmem>>, vector<16x128xf32>
    tpu.vector_store %arg12[%c144, %c0_43], %69 {strides = array<i32>} : memref<192x128xf32, #tpu.memory_space<vmem>>, vector<16x128xf32>,
    %c160 = arith.constant 160 : index
    %c0_44 = arith.constant 0 : index
    %74 = vector.load %arg12[%c160, %c0_44] : memref<192x128xf32, #tpu.memory_space<vmem>>, vector<16x128xf32>
    tpu.vector_store %arg12[%c160, %c0_44], %33 {strides = array<i32>} : memref<192x128xf32, #tpu.memory_space<vmem>>, vector<16x128xf32>,
    %c176 = arith.constant 176 : index
    %c0_45 = arith.constant 0 : index
    %75 = vector.load %arg12[%c176, %c0_45] : memref<192x128xf32, #tpu.memory_space<vmem>>, vector<16x128xf32>
    tpu.vector_store %arg12[%c176, %c0_45], %72 {strides = array<i32>} : memref<192x128xf32, #tpu.memory_space<vmem>>, vector<16x128xf32>,
    %c0_46 = arith.constant 0 : index
    %c0_47 = arith.constant 0 : index
    %76 = vector.load %arg6[%c0_46, %c0_47] : memref<16x192xf32, #tpu.memory_space<vmem>>, vector<16x192xf32>
    %c0_48 = arith.constant 0 : index
    %c0_49 = arith.constant 0 : index
    %77 = vector.load %arg12[%c0_48, %c0_49] : memref<192x128xf32, #tpu.memory_space<vmem>>, vector<192x128xf32>
    %cst_50 = arith.constant dense<0.000000e+00> : vector<16x128xf32>
    %78 = tpu.matmul %76, %77, %cst_50 {dimension_numbers = #tpu.dot_dimension_numbers<[1], [0], [0], [1], [0, 0, 1, 1], [], []>} : vector<16x192xf32>, vector<192x128xf32>, vector<16x128xf32> -> vector<16x128xf32>
    %79 = vector.broadcast %23 : vector<16x1xf32> to vector<16x128xf32>
    %80 = arith.mulf %78, %79 : vector<16x128xf32>
    %81 = vector.broadcast %24 : vector<16x1xf32> to vector<16x128xf32>
    %82 = arith.addf %80, %81 : vector<16x128xf32>
    %cst_51 = arith.constant 0.000000e+00 : f32
    %83 = vector.broadcast %cst_51 : f32 to vector<16x128xf32>
    %84 = arith.cmpf ogt, %82, %83 : vector<16x128xf32>
    %cst_52 = arith.constant 0.000000e+00 : f32
    %85 = vector.broadcast %cst_52 : f32 to vector<16x128xf32>
    %86 = arith.minimumf %82, %85 : vector<16x128xf32>
    %87 = math.exp %86 : vector<16x128xf32>
    %cst_53 = arith.constant 1.000000e+00 : f32
    %88 = vector.broadcast %cst_53 : f32 to vector<16x128xf32>
    %89 = arith.subf %87, %88 : vector<16x128xf32>
    %90 = arith.select %84, %82, %89 : vector<16x128xi1>, vector<16x128xf32>
    %91 = arith.addf %90, %33 : vector<16x128xf32>
    %c1_54 = arith.constant 1 : index
    %c0_55 = arith.constant 0 : index
    %c0_56 = arith.constant 0 : index
    %92 = vector.load %arg3[%c1_54, %c0_55, %c0_56] : memref<3x16x128xf32, #tpu.memory_space<vmem>>, vector<2x16x128xf32>
    %c0_57 = arith.constant 0 : index
    %c0_58 = arith.constant 0 : index
    %c0_59 = arith.constant 0 : index
    %93 = vector.load %arg10[%c0_57, %c0_58, %c0_59] : memref<3x16x128xf32, #tpu.memory_space<vmem>>, vector<2x16x128xf32>
    tpu.vector_store %arg10[%c0_57, %c0_58, %c0_59], %92 {strides = array<i32>} : memref<3x16x128xf32, #tpu.memory_space<vmem>>, vector<2x16x128xf32>,
    %c2_60 = arith.constant 2 : index
    %c0_61 = arith.constant 0 : index
    %c0_62 = arith.constant 0 : index
    %94 = vector.load %arg10[%c2_60, %c0_61, %c0_62] : memref<3x16x128xf32, #tpu.memory_space<vmem>>, vector<1x16x128xf32>
    %95 = vector.shape_cast %94 : vector<1x16x128xf32> to vector<16x128xf32>
    %96 = vector.shape_cast %33 : vector<16x128xf32> to vector<1x16x128xf32>
    tpu.vector_store %arg10[%c2_60, %c0_61, %c0_62], %96 {strides = array<i32>} : memref<3x16x128xf32, #tpu.memory_space<vmem>>, vector<1x16x128xf32>,
    %c1_63 = arith.constant 1 : index
    %c0_64 = arith.constant 0 : index
    %c0_65 = arith.constant 0 : index
    %97 = vector.load %arg4[%c1_63, %c0_64, %c0_65] : memref<3x16x128xf32, #tpu.memory_space<vmem>>, vector<2x16x128xf32>
    %c0_66 = arith.constant 0 : index
    %c0_67 = arith.constant 0 : index
    %c0_68 = arith.constant 0 : index
    %98 = vector.load %arg11[%c0_66, %c0_67, %c0_68] : memref<3x16x128xf32, #tpu.memory_space<vmem>>, vector<2x16x128xf32>
    tpu.vector_store %arg11[%c0_66, %c0_67, %c0_68], %97 {strides = array<i32>} : memref<3x16x128xf32, #tpu.memory_space<vmem>>, vector<2x16x128xf32>,
    %c2_69 = arith.constant 2 : index
    %c0_70 = arith.constant 0 : index
    %c0_71 = arith.constant 0 : index
    %99 = vector.load %arg11[%c2_69, %c0_70, %c0_71] : memref<3x16x128xf32, #tpu.memory_space<vmem>>, vector<1x16x128xf32>
    %100 = vector.shape_cast %99 : vector<1x16x128xf32> to vector<16x128xf32>
    %101 = vector.shape_cast %91 : vector<16x128xf32> to vector<1x16x128xf32>
    tpu.vector_store %arg11[%c2_69, %c0_70, %c0_71], %101 {strides = array<i32>} : memref<3x16x128xf32, #tpu.memory_space<vmem>>, vector<1x16x128xf32>,
    %c0_72 = arith.constant 0 : index
    %c0_73 = arith.constant 0 : index
    %c0_74 = arith.constant 0 : index
    %102 = vector.load %arg4[%c0_72, %c0_73, %c0_74] : memref<3x16x128xf32, #tpu.memory_space<vmem>>, vector<1x16x128xf32>
    %103 = vector.shape_cast %102 : vector<1x16x128xf32> to vector<16x128xf32>
    %c1_75 = arith.constant 1 : index
    %c0_76 = arith.constant 0 : index
    %c0_77 = arith.constant 0 : index
    %104 = vector.load %arg4[%c1_75, %c0_76, %c0_77] : memref<3x16x128xf32, #tpu.memory_space<vmem>>, vector<1x16x128xf32>
    %105 = vector.shape_cast %104 : vector<1x16x128xf32> to vector<16x128xf32>
    %c2_78 = arith.constant 2 : index
    %c0_79 = arith.constant 0 : index
    %c0_80 = arith.constant 0 : index
    %106 = vector.load %arg4[%c2_78, %c0_79, %c0_80] : memref<3x16x128xf32, #tpu.memory_space<vmem>>, vector<1x16x128xf32>
    %107 = vector.shape_cast %106 : vector<1x16x128xf32> to vector<16x128xf32>
    %c1_i32_81 = arith.constant 1 : i32
    %108 = tpu.dynamic_rotate %103 by %c1_i32_81 dim 1 : vector<16x128xf32>, i32 -> vector<16x128xf32>
    %cst_82 = arith.constant 0.000000e+00 : f32
    %109 = vector.broadcast %cst_82 : f32 to vector<16x128xf32>
    %110 = arith.select %18, %108, %109 : vector<16x128xi1>, vector<16x128xf32>
    %c127_i32_83 = arith.constant 127 : i32
    %111 = tpu.dynamic_rotate %103 by %c127_i32_83 dim 1 : vector<16x128xf32>, i32 -> vector<16x128xf32>
    %cst_84 = arith.constant 0.000000e+00 : f32
    %112 = vector.broadcast %cst_84 : f32 to vector<16x128xf32>
    %113 = arith.select %20, %111, %112 : vector<16x128xi1>, vector<16x128xf32>
    %c0_85 = arith.constant 0 : index
    %c0_86 = arith.constant 0 : index
    %114 = vector.load %arg12[%c0_85, %c0_86] : memref<192x128xf32, #tpu.memory_space<vmem>>, vector<16x128xf32>
    tpu.vector_store %arg12[%c0_85, %c0_86], %110 {strides = array<i32>} : memref<192x128xf32, #tpu.memory_space<vmem>>, vector<16x128xf32>,
    %c16_87 = arith.constant 16 : index
    %c0_88 = arith.constant 0 : index
    %115 = vector.load %arg12[%c16_87, %c0_88] : memref<192x128xf32, #tpu.memory_space<vmem>>, vector<16x128xf32>
    tpu.vector_store %arg12[%c16_87, %c0_88], %103 {strides = array<i32>} : memref<192x128xf32, #tpu.memory_space<vmem>>, vector<16x128xf32>,
    %c32_89 = arith.constant 32 : index
    %c0_90 = arith.constant 0 : index
    %116 = vector.load %arg12[%c32_89, %c0_90] : memref<192x128xf32, #tpu.memory_space<vmem>>, vector<16x128xf32>
    tpu.vector_store %arg12[%c32_89, %c0_90], %113 {strides = array<i32>} : memref<192x128xf32, #tpu.memory_space<vmem>>, vector<16x128xf32>,
    %c1_i32_91 = arith.constant 1 : i32
    %117 = tpu.dynamic_rotate %105 by %c1_i32_91 dim 1 : vector<16x128xf32>, i32 -> vector<16x128xf32>
    %cst_92 = arith.constant 0.000000e+00 : f32
    %118 = vector.broadcast %cst_92 : f32 to vector<16x128xf32>
    %119 = arith.select %18, %117, %118 : vector<16x128xi1>, vector<16x128xf32>
    %c127_i32_93 = arith.constant 127 : i32
    %120 = tpu.dynamic_rotate %105 by %c127_i32_93 dim 1 : vector<16x128xf32>, i32 -> vector<16x128xf32>
    %cst_94 = arith.constant 0.000000e+00 : f32
    %121 = vector.broadcast %cst_94 : f32 to vector<16x128xf32>
    %122 = arith.select %20, %120, %121 : vector<16x128xi1>, vector<16x128xf32>
    %c48_95 = arith.constant 48 : index
    %c0_96 = arith.constant 0 : index
    %123 = vector.load %arg12[%c48_95, %c0_96] : memref<192x128xf32, #tpu.memory_space<vmem>>, vector<16x128xf32>
    tpu.vector_store %arg12[%c48_95, %c0_96], %119 {strides = array<i32>} : memref<192x128xf32, #tpu.memory_space<vmem>>, vector<16x128xf32>,
    %c64_97 = arith.constant 64 : index
    %c0_98 = arith.constant 0 : index
    %124 = vector.load %arg12[%c64_97, %c0_98] : memref<192x128xf32, #tpu.memory_space<vmem>>, vector<16x128xf32>
    tpu.vector_store %arg12[%c64_97, %c0_98], %105 {strides = array<i32>} : memref<192x128xf32, #tpu.memory_space<vmem>>, vector<16x128xf32>,
    %c80_99 = arith.constant 80 : index
    %c0_100 = arith.constant 0 : index
    %125 = vector.load %arg12[%c80_99, %c0_100] : memref<192x128xf32, #tpu.memory_space<vmem>>, vector<16x128xf32>
    tpu.vector_store %arg12[%c80_99, %c0_100], %122 {strides = array<i32>} : memref<192x128xf32, #tpu.memory_space<vmem>>, vector<16x128xf32>,
    %c1_i32_101 = arith.constant 1 : i32
    %126 = tpu.dynamic_rotate %107 by %c1_i32_101 dim 1 : vector<16x128xf32>, i32 -> vector<16x128xf32>
    %cst_102 = arith.constant 0.000000e+00 : f32
    %127 = vector.broadcast %cst_102 : f32 to vector<16x128xf32>
    %128 = arith.select %18, %126, %127 : vector<16x128xi1>, vector<16x128xf32>
    %c127_i32_103 = arith.constant 127 : i32
    %129 = tpu.dynamic_rotate %107 by %c127_i32_103 dim 1 : vector<16x128xf32>, i32 -> vector<16x128xf32>
    %cst_104 = arith.constant 0.000000e+00 : f32
    %130 = vector.broadcast %cst_104 : f32 to vector<16x128xf32>
    %131 = arith.select %20, %129, %130 : vector<16x128xi1>, vector<16x128xf32>
    %c96_105 = arith.constant 96 : index
    %c0_106 = arith.constant 0 : index
    %132 = vector.load %arg12[%c96_105, %c0_106] : memref<192x128xf32, #tpu.memory_space<vmem>>, vector<16x128xf32>
    tpu.vector_store %arg12[%c96_105, %c0_106], %128 {strides = array<i32>} : memref<192x128xf32, #tpu.memory_space<vmem>>, vector<16x128xf32>,
    %c112_107 = arith.constant 112 : index
    %c0_108 = arith.constant 0 : index
    %133 = vector.load %arg12[%c112_107, %c0_108] : memref<192x128xf32, #tpu.memory_space<vmem>>, vector<16x128xf32>
    tpu.vector_store %arg12[%c112_107, %c0_108], %107 {strides = array<i32>} : memref<192x128xf32, #tpu.memory_space<vmem>>, vector<16x128xf32>,
    %c128_109 = arith.constant 128 : index
    %c0_110 = arith.constant 0 : index
    %134 = vector.load %arg12[%c128_109, %c0_110] : memref<192x128xf32, #tpu.memory_space<vmem>>, vector<16x128xf32>
    tpu.vector_store %arg12[%c128_109, %c0_110], %131 {strides = array<i32>} : memref<192x128xf32, #tpu.memory_space<vmem>>, vector<16x128xf32>,
    %c1_i32_111 = arith.constant 1 : i32
    %135 = tpu.dynamic_rotate %91 by %c1_i32_111 dim 1 : vector<16x128xf32>, i32 -> vector<16x128xf32>
    %cst_112 = arith.constant 0.000000e+00 : f32
    %136 = vector.broadcast %cst_112 : f32 to vector<16x128xf32>
    %137 = arith.select %18, %135, %136 : vector<16x128xi1>, vector<16x128xf32>
    %c127_i32_113 = arith.constant 127 : i32
    %138 = tpu.dynamic_rotate %91 by %c127_i32_113 dim 1 : vector<16x128xf32>, i32 -> vector<16x128xf32>
    %cst_114 = arith.constant 0.000000e+00 : f32
    %139 = vector.broadcast %cst_114 : f32 to vector<16x128xf32>
    %140 = arith.select %20, %138, %139 : vector<16x128xi1>, vector<16x128xf32>
    %c144_115 = arith.constant 144 : index
    %c0_116 = arith.constant 0 : index
    %141 = vector.load %arg12[%c144_115, %c0_116] : memref<192x128xf32, #tpu.memory_space<vmem>>, vector<16x128xf32>
    tpu.vector_store %arg12[%c144_115, %c0_116], %137 {strides = array<i32>} : memref<192x128xf32, #tpu.memory_space<vmem>>, vector<16x128xf32>,
    %c160_117 = arith.constant 160 : index
    %c0_118 = arith.constant 0 : index
    %142 = vector.load %arg12[%c160_117, %c0_118] : memref<192x128xf32, #tpu.memory_space<vmem>>, vector<16x128xf32>
    tpu.vector_store %arg12[%c160_117, %c0_118], %91 {strides = array<i32>} : memref<192x128xf32, #tpu.memory_space<vmem>>, vector<16x128xf32>,
    %c176_119 = arith.constant 176 : index
    %c0_120 = arith.constant 0 : index
    %143 = vector.load %arg12[%c176_119, %c0_120] : memref<192x128xf32, #tpu.memory_space<vmem>>, vector<16x128xf32>
    tpu.vector_store %arg12[%c176_119, %c0_120], %140 {strides = array<i32>} : memref<192x128xf32, #tpu.memory_space<vmem>>, vector<16x128xf32>,
    %c0_121 = arith.constant 0 : index
    %c0_122 = arith.constant 0 : index
    %144 = vector.load %arg7[%c0_121, %c0_122] : memref<16x192xf32, #tpu.memory_space<vmem>>, vector<16x192xf32>
    %c0_123 = arith.constant 0 : index
    %c0_124 = arith.constant 0 : index
    %145 = vector.load %arg12[%c0_123, %c0_124] : memref<192x128xf32, #tpu.memory_space<vmem>>, vector<192x128xf32>
    %cst_125 = arith.constant dense<0.000000e+00> : vector<16x128xf32>
    %146 = tpu.matmul %144, %145, %cst_125 {dimension_numbers = #tpu.dot_dimension_numbers<[1], [0], [0], [1], [0, 0, 1, 1], [], []>} : vector<16x192xf32>, vector<192x128xf32>, vector<16x128xf32> -> vector<16x128xf32>
    %147 = vector.broadcast %25 : vector<16x1xf32> to vector<16x128xf32>
    %148 = arith.mulf %146, %147 : vector<16x128xf32>
    %149 = vector.broadcast %26 : vector<16x1xf32> to vector<16x128xf32>
    %150 = arith.addf %148, %149 : vector<16x128xf32>
    %cst_126 = arith.constant 0.000000e+00 : f32
    %151 = vector.broadcast %cst_126 : f32 to vector<16x128xf32>
    %152 = arith.cmpf ogt, %150, %151 : vector<16x128xf32>
    %cst_127 = arith.constant 0.000000e+00 : f32
    %153 = vector.broadcast %cst_127 : f32 to vector<16x128xf32>
    %154 = arith.minimumf %150, %153 : vector<16x128xf32>
    %155 = math.exp %154 : vector<16x128xf32>
    %cst_128 = arith.constant 1.000000e+00 : f32
    %156 = vector.broadcast %cst_128 : f32 to vector<16x128xf32>
    %157 = arith.subf %155, %156 : vector<16x128xf32>
    %158 = arith.select %152, %150, %157 : vector<16x128xi1>, vector<16x128xf32>
    %159 = vector.extract_strided_slice %158 {offsets = [0, 0], sizes = [8, 128], strides = [1, 1]} : vector<16x128xf32> to vector<8x128xf32>
    %c0_129 = arith.constant 0 : index
    %c0_130 = arith.constant 0 : index
    %160 = vector.load %arg9[%c0_129, %c0_130] : memref<8x256xf32, #tpu.memory_space<vmem>>, vector<8x128xf32>
    tpu.vector_store %arg9[%c0_129, %c0_130], %159 {strides = array<i32>} : memref<8x256xf32, #tpu.memory_space<vmem>>, vector<8x128xf32>,
    %161 = vector.extract_strided_slice %158 {offsets = [8, 0], sizes = [8, 128], strides = [1, 1]} : vector<16x128xf32> to vector<8x128xf32>
    %c0_131 = arith.constant 0 : index
    %c128_132 = arith.constant 128 : index
    %162 = vector.load %arg9[%c0_131, %c128_132] : memref<8x256xf32, #tpu.memory_space<vmem>>, vector<8x128xf32>
    tpu.vector_store %arg9[%c0_131, %c128_132], %161 {strides = array<i32>} : memref<8x256xf32, #tpu.memory_space<vmem>>, vector<8x128xf32>,
    return
  }
  func.func @transform_0(%arg0: i32) -> (i32, i32) {
    %c0_i32 = arith.constant 0 : i32
    %c0_i32_0 = arith.constant 0 : i32
    %c0_i32_1 = arith.constant 0 : i32
    return %c0_i32, %c0_i32_0 : i32, i32
  }
  func.func @transform_1(%arg0: i32) -> (i32, i32) {
    %c0_i32 = arith.constant 0 : i32
    %c0_i32_0 = arith.constant 0 : i32
    %c0_i32_1 = arith.constant 0 : i32
    return %c0_i32, %c0_i32_0 : i32, i32
  }
  func.func @transform_2(%arg0: i32) -> (i32, i32, i32) {
    %c0_i32 = arith.constant 0 : i32
    %c0_i32_0 = arith.constant 0 : i32
    %c0_i32_1 = arith.constant 0 : i32
    %c0_i32_2 = arith.constant 0 : i32
    return %c0_i32, %c0_i32_0, %c0_i32_1 : i32, i32, i32
  }
  func.func @transform_3(%arg0: i32) -> (i32, i32, i32) {
    %c0_i32 = arith.constant 0 : i32
    %c0_i32_0 = arith.constant 0 : i32
    %c0_i32_1 = arith.constant 0 : i32
    %c0_i32_2 = arith.constant 0 : i32
    return %c0_i32, %c0_i32_0, %c0_i32_1 : i32, i32, i32
  }
  func.func @transform_4(%arg0: i32) -> (i32, i32) {
    %c0_i32 = arith.constant 0 : i32
    %c0_i32_0 = arith.constant 0 : i32
    %c0_i32_1 = arith.constant 0 : i32
    return %c0_i32, %c0_i32_0 : i32, i32
  }
  func.func @transform_5(%arg0: i32) -> (i32, i32) {
    %c0_i32 = arith.constant 0 : i32
    %c0_i32_0 = arith.constant 0 : i32
    %c0_i32_1 = arith.constant 0 : i32
    return %c0_i32, %c0_i32_0 : i32, i32
  }
  func.func @transform_6(%arg0: i32) -> (i32, i32) {
    %c0_i32 = arith.constant 0 : i32
    %c0_i32_0 = arith.constant 0 : i32
    %c0_i32_1 = arith.constant 0 : i32
    return %c0_i32, %c0_i32_0 : i32, i32
  }
  func.func @transform_7(%arg0: i32) -> (i32, i32) {
    %c0_i32 = arith.constant 0 : i32
    %c0_i32_0 = arith.constant 0 : i32
    %c0_i32_1 = arith.constant 0 : i32
    return %c0_i32, %c0_i32_0 : i32, i32
  }
  func.func @transform_8(%arg0: i32) -> (i32, i32) {
    %c0_i32 = arith.constant 0 : i32
    %c0_i32_0 = arith.constant 0 : i32
    %c0_i32_1 = arith.constant 0 : i32
    return %c0_i32, %c0_i32_0 : i32, i32
  }
  func.func @transform_9(%arg0: i32) -> (i32, i32, i32) {
    %c0_i32 = arith.constant 0 : i32
    %c0_i32_0 = arith.constant 0 : i32
    %c0_i32_1 = arith.constant 0 : i32
    %c0_i32_2 = arith.constant 0 : i32
    return %c0_i32, %c0_i32_0, %c0_i32_1 : i32, i32, i32
  }
  func.func @transform_10(%arg0: i32) -> (i32, i32, i32) {
    %c0_i32 = arith.constant 0 : i32
    %c0_i32_0 = arith.constant 0 : i32
    %c0_i32_1 = arith.constant 0 : i32
    %c0_i32_2 = arith.constant 0 : i32
    return %c0_i32, %c0_i32_0, %c0_i32_1 : i32, i32, i32
  }
}

</mosaic_0001>

<bundles_post_ra>
// kernel: tile.13
= control target key start
LH: loop header
LB: loop body
LE: loop exit
PB: predicated region body
PF: predicated region fallthrough
CT: control target
= control target key end

     0   :  { %s22_s0 = inlined_call_operand.vmem [shape: f32[8], index: 0, kind: input, shape index: {}]   ;;  %s23_s1 = inlined_call_operand.vmem [shape: f32[2,8], index: 1, kind: output, shape index: {}]  }
   0x1   :  { %v4_v0 = vld [vmem:[%s22_s0] ss:$0 sm:$0xff] }
   0x2   :  { %5 = vst [vmem:[%s23_s1] sm:$0x3] %v4_v0 }

// kernel: tile.14
= control target key start
LH: loop header
LB: loop body
LE: loop exit
PB: predicated region body
PF: predicated region fallthrough
CT: control target
= control target key end

     0   :  { %vm7_vm0 = vcmask 64512   ;;  %vm13_vm1 = vcmask 130112   ;;  %s39_s0 = inlined_call_operand.vmem [shape: f32[2,8], index: 0, kind: input, shape index: {}]   ;;  %s40_s1 = inlined_call_operand.vmem [shape: f32[16], index: 1, kind: output, shape index: {}]  }
   0x1   :  { %v4_v0 = vld [vmem:[%s39_s0] sm:$0x3]  ;;  %s22_s0 = smov 8  }
   0x2   :  { %5 = vst [vmem:[#allocation1] sm:$0x3] %v4_v0 }
   0x9   :  { %v10_v1 = vld [vmem:[#allocation1 + $0x1] sm:$0x1]   ;;  %v6_v2 = vld [vmem:[#allocation1] sm:$0x1]  }
   0xa   :  { %11 = vrot.lane.b32.xlu0 %v10_v1, %s22_s0  ;;  %8 = vst.msk [vmem:[#allocation0] sm:$0x1] %vm7_vm0, %v6_v2  }
  0x7c   :  { %v12_v3 = vpop.permute.xlu0 %11  }
  0x7d   :  { %14 = vst.msk [vmem:[#allocation0] sm:$0x1] %vm13_vm1, %v12_v3  }
  0x84   :  { %v18_v4 = vld [vmem:[#allocation0] sm:$0x1] }
  0x85   :  { %20 = vst [vmem:[%s40_s1] sm:$0x1] %v18_v4 }

// kernel: _lambda_.1
= control target key start
LH: loop header
LB: loop body
LE: loop exit
PB: predicated region body
PF: predicated region fallthrough
CT: control target
= control target key end

     0   :  { %vm64_vm0 = vcmask 130048   ;;  %v908_v3 = vmov 0   ;;  %s909_s12 = smov 1   ;;  %v32_v17 = vlaneseq  ;;  %v911_v18 = vmov 0.0|0.0   ;;  %s1235_s1 = inlined_call_operand.vmem [shape: f32[16,128], index: 1, kind: input, shape index: {}]   ;;  %s1236_s4 = inlined_call_operand.vmem [shape: f32[16,16], index: 4, kind: input, shape index: {}]   ;;  %s1237_s7 = inlined_call_operand.vmem [shape: f32[80,1], index: 7, kind: input, shape index: {}]   ;;  %s1238_s2 = inlined_call_operand.vmem [shape: f32[3,16,128], index: 2, kind: input, shape index: {}]   ;;  %s1239_s9 = inlined_call_operand.vmem [shape: f32[3,16,128], index: 9, kind: output, shape index: {1}]   ;;  %s1240_s0 = inlined_call_operand.vmem [shape: f32[16,128], index: 0, kind: input, shape index: {}]   ;;  %s1241_s5 = inlined_call_operand.vmem [shape: f32[16,192], index: 5, kind: input, shape index: {}]   ;;  %s1242_s3 = inlined_call_operand.vmem [shape: f32[3,16,128], index: 3, kind: input, shape index: {}]   ;;  %s1243_s10 = inlined_call_operand.vmem [shape: f32[3,16,128], index: 10, kind: output, shape index: {2}]   ;;  %s1244_s6 = inlined_call_operand.vmem [shape: f32[16,192], index: 6, kind: input, shape index: {}]   ;;  %s1245_s8 = inlined_call_operand.vmem [shape: f32[8,256], index: 8, kind: output, shape index: {0}]  }
   0x1   :  { %v62_v0 = vld [vmem:[%s1235_s1] sm:$0xff]  ;;  %v63_v1 = vld [vmem:[%s1235_s1 + $0x8] sm:$0xff]  ;;  %818 = vset.pattern.permute.xlu0 %v908_v3  ;;  %859 = vset.pattern.permute.xlu1 %v908_v3  ;;  %v651_v10 = vld [vmem:[%s1238_s2 + $0x10] sm:$0xff]  ;;  %vm268_vm5 = vcmask 523264  }
   0x2   :  { %v60_v2 = vld [vmem:[%s1236_s4] sm:$0xff]  ;;  %v722_v4 = vpack.c.bf16 %v63_v1, %v62_v0  ;;  %v161_v7 = vld [vmem:[%s1238_s2 + $0x8] sm:$0xff]  ;;  %v652_v11 = vld [vmem:[%s1238_s2 + $0x18] sm:$0xff]  ;;  %392 = vst [vmem:[%s1239_s9] sm:$0xff] %v651_v10  ;;  %726 = vmatprep.subr.bf16.mxu1 %v911_v18  ;;  %v33_v19 = vand.u32 127, %v32_v17 }
   0x3   :  { %719 = vmatprep.mubr.msk.f32.mxu0 %vm64_vm0, %v60_v2  ;;  %v48_v5 = vld [vmem:[%s1237_s7] sm:$0xff]  ;;  %v49_v8 = vld [vmem:[%s1237_s7 + $0x8] sm:$0xff]  ;;  %v829_v15 = vpack.i.bf16 %v652_v11, %v651_v10  ;;  %393 = vst [vmem:[%s1239_s9 + $0x8] sm:$0xff] %v652_v11  ;;  %v742_v41 = vpack.c.bf16 %v652_v11, %v651_v10  ;;  %v50_v62 = vld [vmem:[%s1237_s7 + $0x10] sm:$0xff] }
   0x4   :  { %150 = vperm.xlu0 %818, %v48_v5   ;;  %v160_v6 = vld [vmem:[%s1238_s2] sm:$0xff]  ;;  %723 = vmatprep.subr.bf16.mxu0 %v722_v4  ;;  %v61_v12 = vld [vmem:[%s1236_s4 + $0x8] sm:$0xff]  ;;  %v38_v20 = vand.u32 63, %v33_v19  ;;  %v51_v0 = vld [vmem:[%s1237_s7 + $0x18] sm:$0xff] }
   0x5   :  { %v819_v9 = vpack.i.bf16 %v161_v7, %v160_v6  ;;  %725 = vmatpush3.bf16.msra.mxu0 %v722_v4  ;;  %v1002_v13 = vld [vmem:[%s1238_s2 + $0x20] sm:$0xff]  ;;  %v1007_v14 = vld [vmem:[%s1238_s2 + $0x28] sm:$0xff]  ;;  %s910_s2 = smov 127   ;;  %v731_v29 = vpack.c.bf16 %v161_v7, %v160_v6  ;;  %v665_v17 = vld [vmem:[%s1242_s3 + $0x10] sm:$0xff] }
   0x6   :  { %394 = vst [vmem:[%s1239_s9 + $0x10] sm:$0xff] %v1002_v13  ;;  %395 = vst [vmem:[%s1239_s9 + $0x18] sm:$0xff] %v1007_v14  ;;  %v839_v16 = vpack.i.bf16 %v1007_v14, %v1002_v13  ;;  %770 = vmatprep.subr.bf16.mxu0 %v911_v18  ;;  %vm46_vm1 = vcmp.ge.s32.totalorder %v38_v20, 1  ;;  %vm47_vm3 = vcmp.le.s32.totalorder %v38_v20, 62  ;;  %v753_v50 = vpack.c.bf16 %v1007_v14, %v1002_v13  ;;  %v59_v52 = vld [vmem:[%s1240_s0 + $0x8] sm:$0xff]  ;;  %v58_v53 = vld [vmem:[%s1240_s0] sm:$0xff] }
   0x7   :  { %820 = vrot.lane.b32.xlu1 %v819_v9, %s909_s12  ;;  %vm1033_vm2 = vmpackc.low %vm46_vm1, %vm46_vm1  ;;  %v241_v61 = vld [vmem:[%s1241_s5 + $0x8] sm:$0xff]  ;;  %v52_v63 = vld [vmem:[%s1237_s7 + $0x20] sm:$0xff]  ;;  %404 = vst [vmem:[%s1243_s10] sm:$0xff] %v665_v17 }
   0x8   :  { %155 = vperm.xlu0 %818, %v49_v8   ;;  %720 = vmatmul.mubr.msk.f32.vlgmr.msra.gmra.mrb[0].mxu0 %vm64_vm0, %v61_v12  ;;  %vm1041_vm4 = vmpackc.low %vm47_vm3, %vm47_vm3  ;;  %v411_v1 = vld [vmem:[%s1242_s3] sm:$0xff]  ;;  %v412_v2 = vld [vmem:[%s1242_s3 + $0x8] sm:$0xff] }
   0x9   :  { %655 = vmatprep.mubr.msk.f32.mxu1 %vm268_vm5, %v241_v61  ;;  %v53_v3 = vld [vmem:[%s1237_s7 + $0x28] sm:$0xff]  ;;  %v860_v4 = vpack.i.bf16 %v412_v2, %v411_v1  ;;  %v240_v14 = vld [vmem:[%s1241_s5] sm:$0xff]  ;;  %v666_v19 = vld [vmem:[%s1242_s3 + $0x18] sm:$0xff] }
   0xa   :  { %405 = vst [vmem:[%s1243_s10 + $0x8] sm:$0xff] %v666_v19  ;;  %v870_v20 = vpack.i.bf16 %v666_v19, %v665_v17  ;;  %v493_v24 = vld [vmem:[%s1244_s6 + $0x18] sm:$0xff] }
   0xb   :  { %825 = vrot.lane.b32.xlu1 %v819_v9, %s910_s2 }
   0xc   :  { %830 = vrot.lane.b32.xlu0 %v829_v15, %s909_s12 }
   0xf   :  { %835 = vrot.lane.b32.xlu1 %v829_v15, %s910_s2  ;;  %v243_v15 = vld [vmem:[%s1241_s5 + $0x18] sm:$0xff] }
  0x10   :  { %840 = vrot.lane.b32.xlu0 %v839_v16, %s909_s12 }
  0x13   :  { %845 = vrot.lane.b32.xlu1 %v839_v16, %s910_s2  ;;  %v242_v16 = vld [vmem:[%s1241_s5 + $0x10] sm:$0xff] }
  0x79   :  { %v821_v21 = vpop.permute.xlu1 %820 }
  0x7a   :  { %v823_v22 = vunpack.i.h.bf16 %v821_v21  ;;  %v822_v23 = vunpack.i.l.bf16 %v821_v21  ;;  %v1145_v21 = vld [vmem:[%s1242_s3 + $0x20] sm:$0xff] }
  0x7b   :  { %406 = vst [vmem:[%s1243_s10 + $0x10] sm:$0xff] %v1145_v21 }
  0x7c   :  { %v727_v25 = vpack.c.bf16 %v823_v22, %v822_v23  ;;  %v1150_v22 = vld [vmem:[%s1242_s3 + $0x28] sm:$0xff] }
  0x7d   :  { %v826_v26 = vpop.permute.xlu1 %825  ;;  %407 = vst [vmem:[%s1243_s10 + $0x18] sm:$0xff] %v1150_v22  ;;  %v880_v23 = vpack.i.bf16 %v1150_v22, %v1145_v21 }
  0x7e   :  { %729 = vmatpush1.bf16.msk.msra.mxu1 %vm1033_vm2, %v727_v25  ;;  %v828_v27 = vunpack.i.h.bf16 %v826_v26  ;;  %v827_v28 = vunpack.i.l.bf16 %v826_v26 }
  0x7f   :  { %730 = vmatprep.subr.bf16.mxu1 %v911_v18 }
  0x80   :  { %v734_v30 = vpack.c.bf16 %v828_v27, %v827_v28  ;;  %v786_v28 = vpack.c.bf16 %v666_v19, %v665_v17  ;;  %v55_v17 = vld [vmem:[%s1237_s7 + $0x38] sm:$0xff]  ;;  %v57_v19 = vld [vmem:[%s1237_s7 + $0x48] sm:$0xff] }
  0x81   :  { %v836_v37 = vpop.permute.xlu1 %835 }
  0x82   :  { %732 = vmatpush1.bf16.msra.mxu1 %v731_v29  ;;  %v838_v39 = vunpack.i.h.bf16 %v836_v37  ;;  %v837_v40 = vunpack.i.l.bf16 %v836_v37  ;;  %v797_v29 = vpack.c.bf16 %v1150_v22, %v1145_v21 }
  0x83   :  { %v151_v31 = vpop.permute.xlu0 %150  ;;  %733 = vmatprep.subr.bf16.mxu1 %v911_v18 }
  0x84   :  { %v745_v43 = vpack.c.bf16 %v838_v39, %v837_v40 }
  0x85   :  { %v846_v47 = vpop.permute.xlu1 %845 }
  0x86   :  { %736 = vmatpush1.bf16.msk.msra.mxu1 %vm1041_vm4, %v734_v30  ;;  %v848_v48 = vunpack.i.h.bf16 %v846_v47  ;;  %v847_v49 = vunpack.i.l.bf16 %v846_v47 }
  0x87   :  { %v156_v33 = vpop.permute.xlu0 %155  ;;  %737 = vmatprep.subr.bf16.mxu1 %v911_v18 }
  0x88   :  { %v756_v51 = vpack.c.bf16 %v848_v48, %v847_v49 }
  0x8b   :  { %v831_v34 = vpop.permute.xlu0 %830 }
  0x8c   :  { %v833_v35 = vunpack.i.h.bf16 %v831_v34  ;;  %v832_v36 = vunpack.i.l.bf16 %v831_v34  ;;  %v775_v34 = vpack.c.bf16 %v412_v2, %v411_v1 }
  0x8e   :  { %v738_v38 = vpack.c.bf16 %v833_v35, %v832_v36 }
  0x8f   :  { %v841_v42 = vpop.permute.xlu0 %840 }
  0x90   :  { %740 = vmatpush1.bf16.msk.msra.mxu1 %vm1033_vm2, %v738_v38  ;;  %v843_v44 = vunpack.i.h.bf16 %v841_v42  ;;  %v842_v45 = vunpack.i.l.bf16 %v841_v42 }
  0x91   :  { %741 = vmatprep.subr.bf16.mxu1 %v911_v18 }
  0x92   :  { %v749_v46 = vpack.c.bf16 %v843_v44, %v842_v45 }
  0x94   :  { %743 = vmatpush1.bf16.msra.mxu1 %v742_v41 }
  0x95   :  { %744 = vmatprep.subr.bf16.mxu1 %v911_v18 }
  0x98   :  { %747 = vmatpush1.bf16.msk.msra.mxu1 %vm1041_vm4, %v745_v43 }
  0x99   :  { %748 = vmatprep.subr.bf16.mxu1 %v911_v18 }
  0x9c   :  { %751 = vmatpush1.bf16.msk.msra.mxu1 %vm1033_vm2, %v749_v46 }
  0x9d   :  { %752 = vmatprep.subr.bf16.mxu1 %v911_v18 }
  0xa0   :  { %754 = vmatpush1.bf16.msra.mxu1 %v753_v50 }
  0xa1   :  { %755 = vmatprep.subr.bf16.mxu1 %v911_v18 }
  0xa4   :  { %758 = vmatpush1.bf16.msk.msra.mxu1 %vm1041_vm4, %v756_v51 }
  0xa5   :  { %759 = vmatprep.subr.bf16.mxu1 %v911_v18 }
  0xdb   :  { %v721_v54 = vpop.f32.mrb[0].mxu0 }
  0xdc   :  { %v147_v55 = vadd.f32 %v721_v54, %v59_v52  ;;  %v137_v56 = vpop.f32.mrb[1].mxu0 }
  0xdd   :  { %v146_v57 = vadd.f32 %v137_v56, %v58_v53 }
  0xde   :  { %v1070_v58 = vadd.f32 %v156_v33, %v147_v55 }
  0xdf   :  { %v1072_v59 = vadd.f32 %v151_v31, %v146_v57 }
  0xe0   :  { %664 = vst [vmem:[%s1239_s9 + $0x28] sm:$0xff] %v1070_v58 }
  0xe1   :  { %663 = vst [vmem:[%s1239_s9 + $0x20] sm:$0xff] %v1072_v59  ;;  %v854_v60 = vpack.i.bf16 %v1070_v58, %v1072_v59  ;;  %v764_v12 = vpack.c.bf16 %v1070_v58, %v1072_v59 }
  0xe3   :  { %855 = vrot.lane.b32.xlu1 %v854_v60, %s910_s2  ;;  %850 = vrot.lane.b32.xlu0 %v854_v60, %s909_s12 }
  0xe7   :  { %352 = vperm.xlu0 %818, %v50_v62   ;;  %357 = vperm.xlu1 %859, %v51_v0  }
  0xeb   :  { %364 = vperm.xlu0 %818, %v52_v63   ;;  %369 = vperm.xlu1 %859, %v53_v3  }
  0xef   :  { %861 = vrot.lane.b32.xlu0 %v860_v4, %s909_s12  ;;  %866 = vrot.lane.b32.xlu1 %v860_v4, %s910_s2 }
  0xf3   :  { %871 = vrot.lane.b32.xlu0 %v870_v20, %s909_s12  ;;  %876 = vrot.lane.b32.xlu1 %v870_v20, %s910_s2  ;;  %v56_v20 = vld [vmem:[%s1237_s7 + $0x40] sm:$0xff] }
  0xf7   :  { %881 = vrot.lane.b32.xlu0 %v880_v23, %s909_s12  ;;  %886 = vrot.lane.b32.xlu1 %v880_v23, %s910_s2 }
 0x155   :  { %v851_v5 = vpop.permute.xlu0 %850  ;;  %v856_v9 = vpop.permute.xlu1 %855 }
 0x156   :  { %v853_v6 = vunpack.i.h.bf16 %v851_v5  ;;  %v852_v7 = vunpack.i.l.bf16 %v851_v5  ;;  %v858_v10 = vunpack.i.h.bf16 %v856_v9  ;;  %v857_v11 = vunpack.i.l.bf16 %v856_v9 }
 0x158   :  { %v760_v8 = vpack.c.bf16 %v853_v6, %v852_v7  ;;  %v767_v13 = vpack.c.bf16 %v858_v10, %v857_v11 }
 0x15a   :  { %762 = vmatpush1.bf16.msk.msra.mxu1 %vm1033_vm2, %v760_v8 }
 0x15b   :  { %763 = vmatprep.subr.bf16.mxu1 %v911_v18 }
 0x15e   :  { %765 = vmatpush1.bf16.msra.mxu1 %v764_v12 }
 0x15f   :  { %766 = vmatprep.subr.bf16.mxu1 %v911_v18 }
 0x162   :  { %769 = vmatpush1.bf16.msk.msra.mxu1 %vm1041_vm4, %v767_v13 }
 0x165   :  { %340 = vmatmul.mubr.f32.vlgmr.msra.gmra.mrb[0].mxu1 %v240_v14 }
 0x166   :  { %656 = vmatprep.mubr.msk.f32.mxu1 %vm268_vm5, %v243_v15  ;;  %v353_v25 = vpop.permute.xlu0 %352  ;;  %v358_v35 = vpop.permute.xlu1 %357 }
 0x169   :  { %345 = vmatmul.mubr.f32.gmra.mrb[2].mxu1 %v242_v16 }
 0x16a   :  { %v365_v26 = vpop.permute.xlu0 %364  ;;  %v370_v36 = vpop.permute.xlu1 %369 }
 0x16e   :  { %v862_v27 = vpop.permute.xlu0 %861  ;;  %v867_v37 = vpop.permute.xlu1 %866 }
 0x16f   :  { %v864_v30 = vunpack.i.h.bf16 %v862_v27  ;;  %v863_v31 = vunpack.i.l.bf16 %v862_v27  ;;  %v869_v38 = vunpack.i.h.bf16 %v867_v37  ;;  %v868_v39 = vunpack.i.l.bf16 %v867_v37 }
 0x171   :  { %v771_v33 = vpack.c.bf16 %v864_v30, %v863_v31  ;;  %v778_v40 = vpack.c.bf16 %v869_v38, %v868_v39  ;;  %v490_v30 = vld [vmem:[%s1244_s6] sm:$0xff]  ;;  %v492_v31 = vld [vmem:[%s1244_s6 + $0x10] sm:$0xff] }
 0x172   :  { %v872_v41 = vpop.permute.xlu0 %871  ;;  %v877_v44 = vpop.permute.xlu1 %876 }
 0x173   :  { %773 = vmatpush1.bf16.msk.msra.mxu0 %vm1033_vm2, %v771_v33  ;;  %v874_v42 = vunpack.i.h.bf16 %v872_v41  ;;  %v873_v43 = vunpack.i.l.bf16 %v872_v41  ;;  %v879_v46 = vunpack.i.h.bf16 %v877_v44  ;;  %v878_v47 = vunpack.i.l.bf16 %v877_v44 }
 0x174   :  { %774 = vmatprep.subr.bf16.mxu0 %v911_v18 }
 0x175   :  { %v782_v45 = vpack.c.bf16 %v874_v42, %v873_v43  ;;  %v789_v51 = vpack.c.bf16 %v879_v46, %v878_v47 }
 0x176   :  { %v882_v57 = vpop.permute.xlu0 %881  ;;  %v887_v0 = vpop.permute.xlu1 %886 }
 0x177   :  { %776 = vmatpush1.bf16.msra.mxu0 %v775_v34  ;;  %v884_v60 = vunpack.i.h.bf16 %v882_v57  ;;  %v883_v61 = vunpack.i.l.bf16 %v882_v57  ;;  %v889_v3 = vunpack.i.h.bf16 %v887_v0  ;;  %v888_v4 = vunpack.i.l.bf16 %v887_v0 }
 0x178   :  { %777 = vmatprep.subr.bf16.mxu0 %v911_v18 }
 0x179   :  { %v793_v1 = vpack.c.bf16 %v884_v60, %v883_v61  ;;  %v800_v6 = vpack.c.bf16 %v889_v3, %v888_v4 }
 0x17b   :  { %780 = vmatpush1.bf16.msk.msra.mxu0 %vm1041_vm4, %v778_v40 }
 0x17c   :  { %781 = vmatprep.subr.bf16.mxu0 %v911_v18 }
 0x17f   :  { %784 = vmatpush1.bf16.msk.msra.mxu0 %vm1033_vm2, %v782_v45 }
 0x180   :  { %785 = vmatprep.subr.bf16.mxu0 %v911_v18 }
 0x183   :  { %787 = vmatpush1.bf16.msra.mxu0 %v786_v28 }
 0x184   :  { %788 = vmatprep.subr.bf16.mxu0 %v911_v18 }
 0x187   :  { %791 = vmatpush1.bf16.msk.msra.mxu0 %vm1041_vm4, %v789_v51 }
 0x188   :  { %792 = vmatprep.subr.bf16.mxu0 %v911_v18 }
 0x18b   :  { %795 = vmatpush1.bf16.msk.msra.mxu0 %vm1033_vm2, %v793_v1 }
 0x18c   :  { %796 = vmatprep.subr.bf16.mxu0 %v911_v18 }
 0x18f   :  { %798 = vmatpush1.bf16.msra.mxu0 %v797_v29 }
 0x190   :  { %799 = vmatprep.subr.bf16.mxu0 %v911_v18 }
 0x193   :  { %802 = vmatpush1.bf16.msk.msra.mxu0 %vm1041_vm4, %v800_v6 }
 0x194   :  { %803 = vmatprep.subr.bf16.mxu0 %v911_v18 }
 0x238   :  { %v341_v48 = vpop.f32.mrb[0].mxu1 }
 0x239   :  { %v360_v49 = vmul.f32 %v353_v25, %v341_v48  ;;  %v343_v50 = vpop.f32.mrb[1].mxu1 }
 0x23b   :  { %v372_v52 = vadd.f32 %v365_v26, %v360_v49 }
 0x23c   :  { %v346_v53 = vpop.f32.mrb[2].mxu1 }
 0x23d   :  { %v376_v54 = vmin.f32 %v372_v52, 0.0  ;;  %v361_v55 = vmul.f32 %v358_v35, %v346_v53  ;;  %v348_v56 = vpop.f32.mrb[3].mxu1  ;;  %vm374_vm6 = vcmp.gt.f32.partialorder %v372_v52, 0.0 }
 0x23f   :  { %v378_v62 = vmul.f32 1.442695, %v376_v54  ;;  %v373_v63 = vadd.f32 %v370_v36, %v361_v55 }
 0x241   :  { %900 = vpow2.f32 %v378_v62  ;;  %v377_v2 = vmin.f32 %v373_v63, 0.0  ;;  %vm375_vm7 = vcmp.gt.f32.partialorder %v373_v63, 0.0 }
 0x243   :  { %v380_v5 = vmul.f32 1.442695, %v377_v2 }
 0x245   :  { %902 = vpow2.f32 %v380_v5 }
 0x24b   :  { %v901_v7 = vpop.eup %900 }
 0x24c   :  { %v657_v8 = vadd.f32 -1.0, %v901_v7 }
 0x24e   :  { %v384_v9 = vsel %vm374_vm6, %v372_v52, %v657_v8 }
 0x24f   :  { %v903_v10 = vpop.eup %902  ;;  %v386_v11 = vadd.f32 %v384_v9, %v1072_v59  ;;  %v491_v59 = vld [vmem:[%s1244_s6 + $0x8] sm:$0xff] }
 0x250   :  { %v658_v12 = vadd.f32 -1.0, %v903_v10  ;;  %675 = vmatprep.mubr.msk.f32.mxu0 %vm268_vm5, %v491_v59 }
 0x251   :  { %669 = vst [vmem:[%s1243_s10 + $0x20] sm:$0xff] %v386_v11 }
 0x252   :  { %v385_v13 = vsel %vm375_vm7, %v373_v63, %v658_v12 }
 0x253   :  { %v387_v14 = vadd.f32 %v385_v13, %v1070_v58  ;;  %v54_v58 = vld [vmem:[%s1237_s7 + $0x30] sm:$0xff] }
 0x255   :  { %670 = vst [vmem:[%s1243_s10 + $0x28] sm:$0xff] %v387_v14  ;;  %v895_v15 = vpack.i.bf16 %v387_v14, %v386_v11  ;;  %v808_v16 = vpack.c.bf16 %v387_v14, %v386_v11 }
 0x257   :  { %896 = vrot.lane.b32.xlu1 %v895_v15, %s910_s2  ;;  %891 = vrot.lane.b32.xlu0 %v895_v15, %s909_s12 }
 0x25b   :  { %606 = vperm.xlu1 %859, %v55_v17   ;;  %601 = vperm.xlu0 %818, %v54_v58  }
 0x25f   :  { %618 = vperm.xlu1 %859, %v57_v19   ;;  %613 = vperm.xlu0 %818, %v56_v20  }
 0x2c9   :  { %v892_v21 = vpop.permute.xlu0 %891  ;;  %v897_v26 = vpop.permute.xlu1 %896 }
 0x2ca   :  { %v894_v22 = vunpack.i.h.bf16 %v892_v21  ;;  %v893_v23 = vunpack.i.l.bf16 %v892_v21  ;;  %v899_v27 = vunpack.i.h.bf16 %v897_v26  ;;  %v898_v28 = vunpack.i.l.bf16 %v897_v26 }
 0x2cc   :  { %v804_v25 = vpack.c.bf16 %v894_v22, %v893_v23  ;;  %v811_v29 = vpack.c.bf16 %v899_v27, %v898_v28 }
 0x2ce   :  { %806 = vmatpush1.bf16.msk.msra.mxu0 %vm1033_vm2, %v804_v25 }
 0x2cf   :  { %807 = vmatprep.subr.bf16.mxu0 %v911_v18 }
 0x2d2   :  { %809 = vmatpush1.bf16.msra.mxu0 %v808_v16 }
 0x2d3   :  { %810 = vmatprep.subr.bf16.mxu0 %v911_v18 }
 0x2d6   :  { %813 = vmatpush1.bf16.msk.msra.mxu0 %vm1041_vm4, %v811_v29 }
 0x2d9   :  { %589 = vmatmul.mubr.f32.vlgmr.msra.gmra.mrb[2].mxu0 %v490_v30 }
 0x2da   :  { %676 = vmatprep.mubr.msk.f32.mxu0 %vm268_vm5, %v493_v24  ;;  %v602_v18 = vpop.permute.xlu0 %601  ;;  %v607_v33 = vpop.permute.xlu1 %606 }
 0x2dd   :  { %594 = vmatmul.mubr.f32.gmra.mrb[4].mxu0 %v492_v31 }
 0x2de   :  { %v614_v36 = vpop.permute.xlu0 %613  ;;  %v619_v42 = vpop.permute.xlu1 %618 }
 0x3ac   :  { %v590_v32 = vpop.f32.mrb[2].mxu0 }
 0x3ad   :  { %v609_v34 = vmul.f32 %v602_v18, %v590_v32  ;;  %v592_v35 = vpop.f32.mrb[3].mxu0 }
 0x3af   :  { %v621_v37 = vadd.f32 %v614_v36, %v609_v34 }
 0x3b0   :  { %v595_v38 = vpop.f32.mrb[4].mxu0 }
 0x3b1   :  { %v625_v39 = vmin.f32 %v621_v37, 0.0  ;;  %v610_v40 = vmul.f32 %v607_v33, %v595_v38  ;;  %v597_v41 = vpop.f32.mrb[5].mxu0  ;;  %vm623_vm8 = vcmp.gt.f32.partialorder %v621_v37, 0.0 }
 0x3b3   :  { %v627_v43 = vmul.f32 1.442695, %v625_v39  ;;  %v622_v44 = vadd.f32 %v619_v42, %v610_v40 }
 0x3b5   :  { %904 = vpow2.f32 %v627_v43  ;;  %v626_v45 = vmin.f32 %v622_v44, 0.0  ;;  %vm624_vm9 = vcmp.gt.f32.partialorder %v622_v44, 0.0 }
 0x3b7   :  { %v629_v46 = vmul.f32 1.442695, %v626_v45 }
 0x3b9   :  { %906 = vpow2.f32 %v629_v46 }
 0x3bf   :  { %v905_v47 = vpop.eup %904 }
 0x3c0   :  { %v677_v48 = vadd.f32 -1.0, %v905_v47 }
 0x3c2   :  { %v633_v49 = vsel %vm623_vm8, %v621_v37, %v677_v48 }
 0x3c3   :  { %v907_v50 = vpop.eup %906  ;;  %635 = vst [vmem:[%s1245_s8] sm:$0xff] %v633_v49 }
 0x3c4   :  { %v678_v51 = vadd.f32 -1.0, %v907_v50 }
 0x3c6   :  { %v634_v52 = vsel %vm624_vm9, %v622_v44, %v678_v51 }
 0x3c7   :  { %636 = vst [vmem:[%s1245_s8 + $0x8] sm:$0xff] %v634_v52 }

</bundles_post_ra>
